<compile_context>
chip_gen: v7x
topology: tpu7x:2x2x1
jax: 0.10.0
libtpu: 0.0.40
codegen_flags: <defaults>
</compile_context>

<pallas_src>
import math

import jax
import jax.numpy as jnp
from jax.experimental import pallas as pl
from jax.experimental.pallas import tpu as pltpu

# ---- problem dims (small, consistent with the module's forward) --------------
B = 8      # batch (== sublane count; bias blocks stored B-replicated)
D = 32     # CONFIG.dim.D   (event feature)
M1 = 32    # CONFIG.dim.M_1 (LSTM hidden); 4*M1 == 128 lanes
M2 = 16    # CONFIG.dim.M_2 (context state)
E = 24     # CONFIG.dim.E   (decoder input)
LANES = 128

assert B == 8, "layout hard-codes B == 8 sublanes"
assert 4 * M1 == LANES and 2 * M1 + E <= LANES

# ---- packed weight slab row layout (all blocks 8-row aligned) ------------------
R_WZI = 0                  # (D,  128) fused init gate weight (g cols x2)   rows   0: 32
R_WCI = R_WZI + D          # (D,  128) [wc | 0] for c0                      rows  32: 64
R_WSF = R_WCI + D          # (D,  128) step gate weight, f path (w1f@wih)   rows  64: 96
R_WSS = R_WSF + D          # (M2, 128) step gate weight, s path (w1s@wih)   rows  96:112
R_WSH = R_WSS + M2         # (M1, 128) step gate weight, h path (whh)       rows 112:144
R_W2 = R_WSH + M1          # (M1, 128) w2 placed at cols 64:88              rows 144:176
R_BZI = R_W2 + M1          # (B,  128) init gate bias (g cols x2)           rows 176:184
R_BCI = R_BZI + B          # (B,  128) init c0 bias                         rows 184:192
R_BZS = R_BCI + B          # (B,  128) step gate bias (g cols x2)           rows 192:200
R_B2 = R_BZS + B           # (B,  128) b2 placed at cols 64:88              rows 200:208
W_ROWS = R_B2 + B          # 208 total rows (~104 KB f32)


# ---- shared LSTM tail (inside the kernels) -------------------------------------
def _lstm_tail(z, c_prev, w_ref):
    # ONE full-width (8,128) sigmoid; tanh recovered as 2*sigmoid(2x)-1 because the
    # g-gate columns of the fused weights/bias were pre-scaled by 2 (exact algebra).
    sig = jax.nn.sigmoid(z)
    i_g = sig[:, 0 * M1:1 * M1]
    f_g = sig[:, 1 * M1:2 * M1]
    g_g = 2.0 * sig[:, 2 * M1:3 * M1] - 1.0
    o_g = sig[:, 3 * M1:4 * M1]
    c_new = f_g * c_prev + i_g * g_g
    h_new = o_g * (2.0 * jax.nn.sigmoid(2.0 * c_new) - 1.0)   # tanh(c_new)
    # o = h_new @ w2 + b2, landed directly in lanes 64:88 (exact zeros elsewhere).
    o_full = (jnp.dot(h_new, w_ref[R_W2:R_W2 + M1, :],
                      preferred_element_type=jnp.float32)
              + w_ref[R_B2:R_B2 + B, :])
    return h_new, c_new, o_full


def _store_packed(out_ref, h_new, c_new, o_full):
    # Packed output lanes: [ h | c | o | 0 ].  Full (8,128) store first, then exact
    # lane-slice overwrites for h and c (no identity matmuls -> bit-exact pass-through).
    out_ref[...] = o_full
    out_ref[:, 0:M1] = h_new
    out_ref[:, M1:2 * M1] = c_new


# ---- single-call kernels (module-style cell API) -------------------------------
def event_cell_init_kernel(f_ref, w_ref, out_ref):
    f = f_ref[...]                                                  # (B, D)
    z = (jnp.dot(f, w_ref[R_WZI:R_WZI + D, :],
                 preferred_element_type=jnp.float32)
         + w_ref[R_BZI:R_BZI + B, :])                               # (B, 128) gates
    c0 = (jnp.dot(f, w_ref[R_WCI:R_WCI + D, :],
                  preferred_element_type=jnp.float32)
          + w_ref[R_BCI:R_BCI + B, :])[:, 0:M1]                     # (B, M1)
    _store_packed(out_ref, *_lstm_tail(z, c0, w_ref))


def event_cell_step_kernel(f_ref, s_ref, state_ref, w_ref, out_ref):
    # state_ref is the previous packed output: h in lanes 0:32, c in lanes 32:64.
    f = f_ref[...]
    s = s_ref[...]
    h = state_ref[:, 0:M1]
    c = state_ref[:, M1:2 * M1]
    z = (jnp.dot(f, w_ref[R_WSF:R_WSF + D, :],
                 preferred_element_type=jnp.float32)
         + jnp.dot(s, w_ref[R_WSS:R_WSS + M2, :],
                   preferred_element_type=jnp.float32)
         + jnp.dot(h, w_ref[R_WSH:R_WSH + M1, :],
                   preferred_element_type=jnp.float32)
         + w_ref[R_BZS:R_BZS + B, :])                               # (B, 128) gates
    _store_packed(out_ref, *_lstm_tail(z, c, w_ref))


# ---- recurrent kernel: whole (streams, T) loop inside one pallas_call ----------
def event_cell_seq_kernel(f_ref, s_ref, w_ref, out_ref, h_sc, c_sc):
    t = pl.program_id(1)
    f = f_ref[...]                                                  # (B, D)

    @pl.when(t == 0)
    def _():
        # init branch: s/h/c initialized from f (all linears folded into wz_init).
        z = (jnp.dot(f, w_ref[R_WZI:R_WZI + D, :],
                     preferred_element_type=jnp.float32)
             + w_ref[R_BZI:R_BZI + B, :])
        c0 = (jnp.dot(f, w_ref[R_WCI:R_WCI + D, :],
                      preferred_element_type=jnp.float32)
              + w_ref[R_BCI:R_BCI + B, :])[:, 0:M1]
        h_new, c_new, o_full = _lstm_tail(z, c0, w_ref)
        _store_packed(out_ref, h_new, c_new, o_full)
        h_sc[...] = h_new
        c_sc[...] = c_new

    @pl.when(t > 0)
    def _():
        s = s_ref[...]                                              # (B, M2)
        z = (jnp.dot(f, w_ref[R_WSF:R_WSF + D, :],
                     preferred_element_type=jnp.float32)
             + jnp.dot(s, w_ref[R_WSS:R_WSS + M2, :],
                       preferred_element_type=jnp.float32)
             + jnp.dot(h_sc[...], w_ref[R_WSH:R_WSH + M1, :],
                       preferred_element_type=jnp.float32)
             + w_ref[R_BZS:R_BZS + B, :])
        h_new, c_new, o_full = _lstm_tail(z, c_sc[...], w_ref)
        _store_packed(out_ref, h_new, c_new, o_full)
        h_sc[...] = h_new
        c_sc[...] = c_new


# ---- wrappers -------------------------------------------------------------------
def _vmem():
    return pl.BlockSpec(memory_space=pltpu.MemorySpace.VMEM)


def split_packed(packed):
    """[h | c | o | 0] lanes -> (h, c, o). Slice only when the consumer needs it."""
    return (packed[..., 0:M1],
            packed[..., M1:2 * M1],
            packed[..., 2 * M1:2 * M1 + E])


@jax.jit
def cell_init_packed(f, wbuf):
    """s is None branch; returns the packed (B,128) state/output slab."""
    return pl.pallas_call(
        event_cell_init_kernel,
        out_shape=jax.ShapeDtypeStruct((B, LANES), jnp.float32),
        in_specs=[_vmem(), _vmem()],
        out_specs=_vmem(),
    )(f, wbuf)


@jax.jit
def cell_step_packed(f, s, packed_state, wbuf):
    """Step branch fed with the previous packed output (no XLA concat/split)."""
    return pl.pallas_call(
        event_cell_step_kernel,
        out_shape=jax.ShapeDtypeStruct((B, LANES), jnp.float32),
        in_specs=[_vmem(), _vmem(), _vmem(), _vmem()],
        out_specs=_vmem(),
    )(f, s, packed_state, wbuf)


def event_encoder_cell(f, wbuf, s=None, h=None, c=None):
    """Drop-in equivalent of EventEncoderCell.forward -> (h, c, o).
    Compatibility API only; the hot paths are cell_*_packed / event_encoder_sequence."""
    if s is None:
        packed = cell_init_packed(f, wbuf)
    else:
        state = (jnp.zeros((B, LANES), jnp.float32)
                 .at[:, 0:M1].set(h).at[:, M1:2 * M1].set(c))
        packed = cell_step_packed(f, s, state, wbuf)
    return split_packed(packed)


@jax.jit
def event_encoder_sequence(f_seq, s_seq, wbuf):
    """Run the cell over (S streams, T steps) inside ONE pallas_call.

    f_seq: (S, T, B, D); s_seq: (S, T, B, M2) (s_seq[:, 0] is ignored — step 0 is
    the `s is None` init branch).  Weight slab is DMA'd once (constant index_map);
    h/c carried in VMEM scratch; stream axis is "parallel" for v7x megacore.
    Returns (h_seq, c_seq, o_seq).
    """
    S, T = f_seq.shape[0], f_seq.shape[1]
    packed_seq = pl.pallas_call(
        event_cell_seq_kernel,
        out_shape=jax.ShapeDtypeStruct((S, T, B, LANES), jnp.float32),
        grid=(S, T),
        in_specs=[
            pl.BlockSpec((None, None, B, D), lambda si, t: (si, t, 0, 0)),
            pl.BlockSpec((None, None, B, M2), lambda si, t: (si, t, 0, 0)),
            pl.BlockSpec((W_ROWS, LANES), lambda si, t: (0, 0)),   # resident weights
        ],
        out_specs=pl.BlockSpec((None, None, B, LANES), lambda si, t: (si, t, 0, 0)),
        scratch_shapes=[pltpu.VMEM((B, M1), jnp.float32),          # carried h
                        pltpu.VMEM((B, M1), jnp.float32)],         # carried c
        compiler_params=pltpu.CompilerParams(
            dimension_semantics=("parallel", "arbitrary")),
    )(f_seq, s_seq, wbuf)
    return split_packed(packed_seq)


# ---- deterministic raw parameters (PyTorch-style uniform init) -------------------
def make_params(key):
    def lin(k, fan_in, fan_out):
        kw, kb = jax.random.split(k)
        bound = 1.0 / math.sqrt(fan_in)
        w = jax.random.uniform(kw, (fan_in, fan_out), jnp.float32, -bound, bound)
        b = jax.random.uniform(kb, (1, fan_out), jnp.float32, -bound, bound)
        return w, b

    keys = jax.random.split(key, 8)
    ws, bs = lin(keys[0], D, M2)            # init_s
    wh, bh = lin(keys[1], D, M1)            # init_h
    wc, bc = lin(keys[2], D, M1)            # init_c
    w1, b1 = lin(keys[3], D + M2, M1)       # linear1 on cat([f, s])
    w1f, w1s = w1[:D, :], w1[D:, :]
    bound = 1.0 / math.sqrt(M1)             # LSTMCell init
    wih = jax.random.uniform(keys[4], (M1, 4 * M1), jnp.float32, -bound, bound)
    whh = jax.random.uniform(keys[5], (M1, 4 * M1), jnp.float32, -bound, bound)
    b_ih = jax.random.uniform(keys[6], (1, 4 * M1), jnp.float32, -bound, bound)
    b_hh = jax.random.uniform(keys[7], (1, 4 * M1), jnp.float32, -bound, bound)
    bl = b_ih + b_hh
    w2, b2 = lin(jax.random.fold_in(key, 99), M1, E)   # linear2
    return dict(ws=ws, bs=bs, wh=wh, bh=bh, wc=wc, bc=bc,
                w1f=w1f, w1s=w1s, b1=b1, wih=wih, whh=whh, bl=bl,
                w2=w2, b2=b2)


# ---- host-side algebraic fusion into one 128-lane packed slab --------------------
def fuse_params(p):
    # Pre-scale the g-gate columns by 2 so tanh(z_g) == 2*sigmoid(2*z_g)-1 in-kernel.
    gscale = jnp.ones((1, 4 * M1), jnp.float32).at[:, 2 * M1:3 * M1].set(2.0)

    # init branch: z = f @ wz_init + bz_init  (folds init_s, init_h, linear1, LSTM-ih/hh)
    wz_init = ((p["w1f"] + p["ws"] @ p["w1s"]) @ p["wih"] + p["wh"] @ p["whh"]) * gscale
    bz_init = ((p["bs"] @ p["w1s"] + p["b1"]) @ p["wih"]
               + p["bh"] @ p["whh"] + p["bl"]) * gscale
    # init c0 = f @ wc + bc, lane-padded to 128
    wc_init = jnp.zeros((D, LANES), jnp.float32).at[:, :M1].set(p["wc"])
    bc_init = jnp.zeros((1, LANES), jnp.float32).at[:, :M1].set(p["bc"])
    # step branch: z = f @ (w1f@wih) + s @ (w1s@wih) + h @ whh + (b1@wih + bl)
    wz_step_f = (p["w1f"] @ p["wih"]) * gscale
    wz_step_s = (p["w1s"] @ p["wih"]) * gscale
    wz_step_h = p["whh"] * gscale
    bz_step = (p["b1"] @ p["wih"] + p["bl"]) * gscale
    # output projection: w2/b2 placed directly at packed lanes 64:88
    w2_pad = jnp.zeros((M1, LANES), jnp.float32).at[:, 2 * M1:2 * M1 + E].set(p["w2"])
    b2_pad = jnp.zeros((1, LANES), jnp.float32).at[:, 2 * M1:2 * M1 + E].set(p["b2"])

    def rep(b):  # replicate a (1,128) bias row into a (B,128) block (B == 8 sublanes)
        return jnp.broadcast_to(b, (B, LANES))

    wbuf = jnp.concatenate([
        wz_init, wc_init, wz_step_f, wz_step_s, wz_step_h, w2_pad,
        rep(bz_init), rep(bc_init), rep(bz_step), rep(b2_pad),
    ], axis=0)
    assert wbuf.shape == (W_ROWS, LANES)
    return wbuf


# ---- pure-JAX reference (mirrors the PyTorch forward, unfused) --------------------
def reference(f, p, s=None, h=None, c=None):
    if s is None:
        s = f @ p["ws"] + p["bs"]
        h = f @ p["wh"] + p["bh"]
        c = f @ p["wc"] + p["bc"]
    x = f @ p["w1f"] + s @ p["w1s"] + p["b1"]
    z = x @ p["wih"] + h @ p["whh"] + p["bl"]
    i_g = jax.nn.sigmoid(z[:, 0 * M1:1 * M1])
    f_g = jax.nn.sigmoid(z[:, 1 * M1:2 * M1])
    g_g = jnp.tanh(z[:, 2 * M1:3 * M1])
    o_g = jax.nn.sigmoid(z[:, 3 * M1:4 * M1])
    c_new = f_g * c + i_g * g_g
    h_new = o_g * jnp.tanh(c_new)
    o = h_new @ p["w2"] + p["b2"]
    return h_new, c_new, o


if __name__ == "__main__":
    key = jax.random.PRNGKey(0)
    kp, kf, ks = jax.random.split(key, 3)
    params = make_params(kp)
    wbuf = fuse_params(params)

    # ---------- single-call cell demo: packed state fed straight back ----------
    f_pair = jax.random.normal(kf, (2, B, D), jnp.float32)
    f0, f1 = f_pair[0], f_pair[1]

    packed1 = cell_init_packed(f0, wbuf)                 # s is None branch
    s1 = f0 @ params["ws"] + params["bs"]                # carried s is external glue
    packed2 = cell_step_packed(f1, s1, packed1, wbuf)    # no split/concat in between
    jax.block_until_ready((packed1, packed2))

    h1, c1, o1 = split_packed(packed1)
    h2, c2, o2 = split_packed(packed2)
    rh1, rc1, ro1 = reference(f0, params)
    rh2, rc2, ro2 = reference(f1, params, s=s1, h=rh1, c=rc1)
    for a, b in [(h1, rh1), (c1, rc1), (o1, ro1), (h2, rh2), (c2, rc2), (o2, ro2)]:
        assert jnp.allclose(a, b, rtol=1e-4, atol=1e-4), "single-step mismatch"

    # Module-signature compatibility path (raw h, c in) — also checked.
    hh, cc, oo = event_encoder_cell(f1, wbuf, s=s1, h=h1, c=c1)
    jax.block_until_ready((hh, cc, oo))
    assert jnp.allclose(hh, rh2, rtol=1e-4, atol=1e-4)
    assert jnp.allclose(cc, rc2, rtol=1e-4, atol=1e-4)
    assert jnp.allclose(oo, ro2, rtol=1e-4, atol=1e-4)

    # ---------- recurrent demo: (S streams, T steps) in ONE pallas_call ----------
    S, T = 2, 8
    kfa, kfb = jax.random.split(ks)
    f_seq = jax.random.normal(kfa, (S, T, B, D), jnp.float32)
    s_seq = jax.random.normal(kfb, (S, T, B, M2), jnp.float32)   # s_seq[:, 0] unused
    h_seq, c_seq, o_seq = event_encoder_sequence(f_seq, s_seq, wbuf)
    jax.block_until_ready((h_seq, c_seq, o_seq))

    for si in range(S):
        rh, rc, ro = reference(f_seq[si, 0], params)              # step 0 = init branch
        for t in range(T):
            if t > 0:
                rh, rc, ro = reference(f_seq[si, t], params,
                                       s=s_seq[si, t], h=rh, c=rc)
            # slightly looser tolerance: fused-weight f32 sum-order deltas compound over T
            assert jnp.allclose(h_seq[si, t], rh, rtol=1e-3, atol=1e-3), "seq h mismatch"
            assert jnp.allclose(c_seq[si, t], rc, rtol=1e-3, atol=1e-3), "seq c mismatch"
            assert jnp.allclose(o_seq[si, t], ro, rtol=1e-3, atol=1e-3), "seq o mismatch"

    print("KERNEL_OK")
</pallas_src>

<mosaic_0001>
module attributes {stable_mosaic.version = 11 : i64} {
  func.func @event_cell_init_kernel(%arg0: memref<8x32xf32, #tpu.memory_space<vmem>>, %arg1: memref<208x128xf32, #tpu.memory_space<vmem>>, %arg2: memref<8x128xf32, #tpu.memory_space<vmem>>) attributes {dimension_semantics = [], scalar_prefetch = 0 : i64, scratch_operands = 0 : i64, tpu.core_type = #tpu.core_type<tc>} {
    %c0 = arith.constant 0 : index
    %c0_0 = arith.constant 0 : index
    %0 = vector.load %arg0[%c0, %c0_0] : memref<8x32xf32, #tpu.memory_space<vmem>>, vector<8x32xf32>
    %c0_1 = arith.constant 0 : index
    %c0_2 = arith.constant 0 : index
    %1 = vector.load %arg1[%c0_1, %c0_2] : memref<208x128xf32, #tpu.memory_space<vmem>>, vector<32x128xf32>
    %cst = arith.constant dense<0.000000e+00> : vector<8x128xf32>
    %2 = tpu.matmul %0, %1, %cst {dimension_numbers = #tpu.dot_dimension_numbers<[1], [0], [0], [1], [0, 0, 1, 1], [], []>} : vector<8x32xf32>, vector<32x128xf32>, vector<8x128xf32> -> vector<8x128xf32>
    %c176 = arith.constant 176 : index
    %c0_3 = arith.constant 0 : index
    %3 = vector.load %arg1[%c176, %c0_3] : memref<208x128xf32, #tpu.memory_space<vmem>>, vector<8x128xf32>
    %4 = arith.addf %2, %3 : vector<8x128xf32>
    %c32 = arith.constant 32 : index
    %c0_4 = arith.constant 0 : index
    %5 = vector.load %arg1[%c32, %c0_4] : memref<208x128xf32, #tpu.memory_space<vmem>>, vector<32x128xf32>
    %cst_5 = arith.constant dense<0.000000e+00> : vector<8x128xf32>
    %6 = tpu.matmul %0, %5, %cst_5 {dimension_numbers = #tpu.dot_dimension_numbers<[1], [0], [0], [1], [0, 0, 1, 1], [], []>} : vector<8x32xf32>, vector<32x128xf32>, vector<8x128xf32> -> vector<8x128xf32>
    %c184 = arith.constant 184 : index
    %c0_6 = arith.constant 0 : index
    %7 = vector.load %arg1[%c184, %c0_6] : memref<208x128xf32, #tpu.memory_space<vmem>>, vector<8x128xf32>
    %8 = arith.addf %6, %7 : vector<8x128xf32>
    %9 = vector.extract_strided_slice %8 {offsets = [0, 0], sizes = [8, 32], strides = [1, 1]} : vector<8x128xf32> to vector<8x32xf32>
    %10 = arith.negf %4 : vector<8x128xf32>
    %11 = math.exp %10 : vector<8x128xf32>
    %cst_7 = arith.constant 1.000000e+00 : f32
    %12 = vector.broadcast %cst_7 : f32 to vector<8x128xf32>
    %13 = arith.addf %12, %11 : vector<8x128xf32>
    %14 = arith.divf %12, %13 : vector<8x128xf32>
    %15 = vector.extract_strided_slice %14 {offsets = [0, 0], sizes = [8, 32], strides = [1, 1]} : vector<8x128xf32> to vector<8x32xf32>
    %16 = vector.extract_strided_slice %14 {offsets = [0, 32], sizes = [8, 32], strides = [1, 1]} : vector<8x128xf32> to vector<8x32xf32>
    %17 = vector.extract_strided_slice %14 {offsets = [0, 64], sizes = [8, 32], strides = [1, 1]} : vector<8x128xf32> to vector<8x32xf32>
    %cst_8 = arith.constant 2.000000e+00 : f32
    %18 = vector.broadcast %cst_8 : f32 to vector<8x32xf32>
    %19 = arith.mulf %18, %17 : vector<8x32xf32>
    %cst_9 = arith.constant 1.000000e+00 : f32
    %20 = vector.broadcast %cst_9 : f32 to vector<8x32xf32>
    %21 = arith.subf %19, %20 : vector<8x32xf32>
    %22 = vector.extract_strided_slice %14 {offsets = [0, 96], sizes = [8, 32], strides = [1, 1]} : vector<8x128xf32> to vector<8x32xf32>
    %23 = arith.mulf %16, %9 : vector<8x32xf32>
    %24 = arith.mulf %15, %21 : vector<8x32xf32>
    %25 = arith.addf %23, %24 : vector<8x32xf32>
    %cst_10 = arith.constant 2.000000e+00 : f32
    %26 = vector.broadcast %cst_10 : f32 to vector<8x32xf32>
    %27 = arith.mulf %26, %25 : vector<8x32xf32>
    %28 = arith.negf %27 : vector<8x32xf32>
    %29 = math.exp %28 : vector<8x32xf32>
    %cst_11 = arith.constant 1.000000e+00 : f32
    %30 = vector.broadcast %cst_11 : f32 to vector<8x32xf32>
    %31 = arith.addf %30, %29 : vector<8x32xf32>
    %32 = arith.divf %30, %31 : vector<8x32xf32>
    %cst_12 = arith.constant 2.000000e+00 : f32
    %33 = vector.broadcast %cst_12 : f32 to vector<8x32xf32>
    %34 = arith.mulf %33, %32 : vector<8x32xf32>
    %cst_13 = arith.constant 1.000000e+00 : f32
    %35 = vector.broadcast %cst_13 : f32 to vector<8x32xf32>
    %36 = arith.subf %34, %35 : vector<8x32xf32>
    %37 = arith.mulf %22, %36 : vector<8x32xf32>
    %c144 = arith.constant 144 : index
    %c0_14 = arith.constant 0 : index
    %38 = vector.load %arg1[%c144, %c0_14] : memref<208x128xf32, #tpu.memory_space<vmem>>, vector<32x128xf32>
    %cst_15 = arith.constant dense<0.000000e+00> : vector<8x128xf32>
    %39 = tpu.matmul %37, %38, %cst_15 {dimension_numbers = #tpu.dot_dimension_numbers<[1], [0], [0], [1], [0, 0, 1, 1], [], []>} : vector<8x32xf32>, vector<32x128xf32>, vector<8x128xf32> -> vector<8x128xf32>
    %c200 = arith.constant 200 : index
    %c0_16 = arith.constant 0 : index
    %40 = vector.load %arg1[%c200, %c0_16] : memref<208x128xf32, #tpu.memory_space<vmem>>, vector<8x128xf32>
    %41 = arith.addf %39, %40 : vector<8x128xf32>
    %c0_17 = arith.constant 0 : index
    %c0_18 = arith.constant 0 : index
    %42 = vector.load %arg2[%c0_17, %c0_18] : memref<8x128xf32, #tpu.memory_space<vmem>>, vector<8x128xf32>
    tpu.vector_store %arg2[%c0_17, %c0_18], %41 {strides = array<i32>} : memref<8x128xf32, #tpu.memory_space<vmem>>, vector<8x128xf32>,
    %c0_19 = arith.constant 0 : index
    %c0_20 = arith.constant 0 : index
    %43 = vector.load %arg2[%c0_19, %c0_20] : memref<8x128xf32, #tpu.memory_space<vmem>>, vector<8x32xf32>
    tpu.vector_store %arg2[%c0_19, %c0_20], %37 {strides = array<i32>} : memref<8x128xf32, #tpu.memory_space<vmem>>, vector<8x32xf32>,
    %c0_21 = arith.constant 0 : index
    %c32_22 = arith.constant 32 : index
    %44 = vector.load %arg2[%c0_21, %c32_22] : memref<8x128xf32, #tpu.memory_space<vmem>>, vector<8x32xf32>
    tpu.vector_store %arg2[%c0_21, %c32_22], %25 {strides = array<i32>} : memref<8x128xf32, #tpu.memory_space<vmem>>, vector<8x32xf32>,
    return
  }
}

</mosaic_0001>

<bundles_post_ra>
// kernel: cell_init_packed.1
= control target key start
LH: loop header
LB: loop body
LE: loop exit
PB: predicated region body
PF: predicated region fallthrough
CT: control target
= control target key end

     0   :  { %7 = vsyncpa [#allocation3], 0  ;;  %s575_s0 = inlined_call_operand.hbm [shape: f32[8,32], index: 0, kind: input, shape index: {}]   ;;  %s576_s1 = inlined_call_operand.hbm [shape: f32[208,128], index: 1, kind: input, shape index: {}]   ;;  %s577_s2 = inlined_call_operand.hbm [shape: f32[8,128], index: 2, kind: output, shape index: {}]  }
   0x1   :  { %8 = vsyncpa [#allocation6], 0 }
   0x2   :  { %9 = vsyncpa [#allocation4], 0  ;;  %s494_s9 = smov [#allocation2]   ;;  %s495_s11 = smov [#allocation5]  }
   0x3   :  { %s16_s10 = sshll.u32 %s494_s9, 4  ;;  %s25_s12 = sshll.u32 %s495_s11, 4  ;;  %s17_s10 = int_to_ptr.vmem [resolvable:$true] %s16_s10  ;;  %s519_s12 = int_to_ptr.vmem [resolvable:$true] %s25_s12 }
   0x4   :  { %s422_s15 = scalar_lea.hbm %s575_s0, 128 }
   0x5   :  { %p423_p0 = scmp.ne.s32.totalorder %s575_s0, %s422_s15  ;;  %p426_p1 = scmp.lt.u32.totalorder %s422_s15, %s575_s0 }
   0x7   :  { %p428_p2 = pnand %p426_p1, %p423_p0 }
   0x9   :  { %431 = shalt.err (!%p428_p2)
}
   0xa   :  { %s432_s20 = scalar_lea.vmem %s17_s10, 128  ;;  %p437_p4 = scmp.lt.s32.totalorder %s17_s10, %s17_s10 }
   0xb   :  { %p433_p3 = scmp.ne.s32.totalorder %s17_s10, %s432_s20  ;;  %p438_p5 = scmp.lt.s32.totalorder %s432_s20, %s432_s20 }
   0xd   :  { %p439_p6 = por %p438_p5, %p437_p4 }
   0xf   :  { %p440_p7 = pnand %p439_p6, %p433_p3 }
  0x11   :  { %443 = shalt.err (!%p440_p7)
}
  0x12   :  { %19 = dma.hbm_to_vmem [thread:$0]  %s575_s0, 128, %s17_s10, [#allocation3]  }
  0x13   :  { %s444_s25 = scalar_lea.hbm %s576_s1, 3328 }
  0x14   :  { %p445_p8 = scmp.ne.s32.totalorder %s576_s1, %s444_s25  ;;  %p448_p9 = scmp.lt.u32.totalorder %s444_s25, %s576_s1 }
  0x16   :  { %p450_p10 = pnand %p448_p9, %p445_p8 }
  0x18   :  { %453 = shalt.err (!%p450_p10)
}
  0x19   :  { %s454_s30 = scalar_lea.vmem %s519_s12, 3328  ;;  %p459_p12 = scmp.lt.s32.totalorder %s519_s12, %s519_s12 }
  0x1a   :  { %p455_p11 = scmp.ne.s32.totalorder %s519_s12, %s454_s30  ;;  %p460_p13 = scmp.lt.s32.totalorder %s454_s30, %s454_s30 }
  0x1c   :  { %p461_p0 = por %p460_p13, %p459_p12 }
  0x1e   :  { %p462_p1 = pnand %p461_p0, %p455_p11 }
  0x20   :  { %465 = shalt.err (!%p462_p1)
}
  0x21   :  { %s496_s0 = smov 128   ;;  %s497_s3 = smov 8  }
  0x22   :  { %31 = dma.hbm_to_vmem [thread:$0]  %s576_s1, 3328, %s519_s12, [#allocation6], %s496_s0, %s496_s0, %s497_s3  }
  0x23   :  { %488 = dma.done.wait [#allocation3], 128  }
  0x24   :  { %489 = vsyncadd [#allocation3], 4294967168 }
  0x25   :  { %490 = dma.done.wait [#allocation6], 3328  }
  0x26   :  { %491 = vsyncadd [#allocation6], 4294963968  ;;  %v498_v0 = vmov 0.0|0.0   ;;  %vm499_vm0 = vmmov 0   ;;  %v500_v1 = vmov 0.0   ;;  %v39_v2 = vld [vmem:[#allocation5] sm:$0xff] }
  0x27   :  { %386 = vmatprep.subr.bf16.mxu0 %v498_v0  ;;  %361 = vmatprep.mubr.msk.f32.mxu0 %vm499_vm0, %v500_v1  ;;  %v40_v3 = vld [vmem:[#allocation5 + $0x8] sm:$0xff]  ;;  %v41_v4 = vld [vmem:[#allocation5 + $0x10] sm:$0xff]  ;;  %v42_v6 = vld [vmem:[#allocation5 + $0x18] sm:$0xff]  ;;  %vm44_vm1 = vcmask 261120   ;;  %s501_s1 = smov 64   ;;  %s502_s6 = smov 32  }
  0x28   :  { %392 = vmatprep.subr.bf16.mxu1 %v498_v0  ;;  %372 = vmatprep.mubr.msk.f32.mxu1 %vm499_vm0, %v500_v1  ;;  %v387_v5 = vpack.c.bf16 %v40_v3, %v39_v2  ;;  %v118_v7 = vld [vmem:[#allocation5 + $0x20] sm:$0xff]  ;;  %v119_v8 = vld [vmem:[#allocation5 + $0x28] sm:$0xff]  ;;  %v120_v9 = vld [vmem:[#allocation5 + $0x30] sm:$0xff]  ;;  %v390_v11 = vpack.c.bf16 %v42_v6, %v41_v4  ;;  %s503_s7 = smov [#allocation7]   ;;  %vm313_vm2 = vcmask 523520  }
  0x29   :  { %v121_v10 = vld [vmem:[#allocation5 + $0x38] sm:$0xff]  ;;  %v393_v12 = vpack.c.bf16 %v119_v8, %v118_v7  ;;  %v43_v15 = vld [vmem:[#allocation5 + $0xb0] sm:$0xff]  ;;  %v232_v41 = vld [vmem:[#allocation5 + $0xa0] sm:$0xff]  ;;  %s321_s8 = sshll.u32 %s503_s7, 4  ;;  %s322_s8 = int_to_ptr.vmem [resolvable:$true] %s321_s8 }
  0x2a   :  { %388 = vmatpush3.bf16.msra.mxu0 %v387_v5  ;;  %v396_v13 = vpack.c.bf16 %v121_v10, %v120_v9  ;;  %v38_v14 = vld [vmem:[#allocation2] sm:$0xff]  ;;  %v230_v39 = vld [vmem:[#allocation5 + $0x90] sm:$0xff]  ;;  %v233_v43 = vld [vmem:[#allocation5 + $0xa8] sm:$0xff]  ;;  %s466_s9 = scalar_lea.vmem %s322_s8, 128  ;;  %p471_p3 = scmp.lt.s32.totalorder %s322_s8, %s322_s8 }
  0x2b   :  { %389 = vmatprep.subr.bf16.mxu0 %v498_v0  ;;  %394 = vmatpush3.bf16.msra.mxu1 %v393_v12  ;;  %v122_v26 = vld [vmem:[#allocation5 + $0xb8] sm:$0xff]  ;;  %v402_v44 = vpack.c.bf16 %v233_v43, %v232_v41  ;;  %v234_v51 = vld [vmem:[#allocation5 + $0xc8] sm:$0xff]  ;;  %p467_p2 = scmp.ne.s32.totalorder %s322_s8, %s466_s9  ;;  %p472_p4 = scmp.lt.s32.totalorder %s466_s9, %s466_s9 }
  0x2c   :  { %395 = vmatprep.subr.bf16.mxu1 %v498_v0  ;;  %v231_v40 = vld [vmem:[#allocation5 + $0x98] sm:$0xff] }
  0x2d   :  { %v399_v42 = vpack.c.bf16 %v231_v40, %v230_v39  ;;  %p473_p5 = por %p472_p4, %p471_p3 }
  0x2e   :  { %391 = vmatpush3.bf16.msra.mxu0 %v390_v11 }
  0x2f   :  { %398 = vmatprep.subr.bf16.mxu0 %v498_v0  ;;  %397 = vmatpush3.bf16.msra.mxu1 %v396_v13  ;;  %p474_p6 = pnand %p473_p5, %p467_p2 }
  0x31   :  { %362 = vmatmul.mubr.msk.f32.vlgmr.msra.gmra.mrb[0].mxu0 %vm44_vm1, %v38_v14 }
  0x32   :  { %383 = vmatprep.mubr.msk.f32.mxu0 %vm499_vm0, %v500_v1  ;;  %373 = vmatmul.mubr.msk.f32.vlgmr.msra.gmra.mrb[0].mxu1 %vm44_vm1, %v38_v14 }
  0x33   :  { %400 = vmatpush3.bf16.msra.mxu0 %v399_v42 }
  0x34   :  { %401 = vmatprep.subr.bf16.mxu0 %v498_v0 }
  0x37   :  { %403 = vmatpush3.bf16.msra.mxu0 %v402_v44 }
 0x104   :  { %v114_v16 = vpop.f32.mrb[0].mxu0 }
 0x105   :  { %v115_v17 = vadd.f32 %v114_v16, %v43_v15  ;;  %v363_v18 = vpop.f32.mrb[1].mxu0  ;;  %v189_v19 = vpop.f32.mrb[0].mxu1 }
 0x106   :  { %v374_v21 = vpop.f32.mrb[1].mxu1  ;;  %v190_v28 = vadd.f32 %v189_v19, %v122_v26 }
 0x107   :  { %v333_v20 = vmul.f32 -1.442695, %v115_v17 }
 0x109   :  { %414 = vpow2.f32 %v333_v20 }
 0x113   :  { %v415_v22 = vpop.eup %414 }
 0x114   :  { %v196_v23 = vadd.f32 1.0, %v415_v22 }
 0x116   :  { %416 = vrcp.f32 %v196_v23 }
 0x120   :  { %v417_v24 = vpop.eup %416 }
 0x121   :  { %v199_v25 = vmul.f32 2.0, %v417_v24 }
 0x123   :  { %v334_v27 = vadd.f32 -1.0, %v199_v25 }
 0x125   :  { %207 = vrot.lane.b32.xlu0 %v334_v27, %s501_s1 }
 0x129   :  { %202 = vrot.lane.b32.xlu0 %v190_v28, %s502_s6 }
 0x197   :  { %v208_v29 = vpop.permute.xlu0 %207 }
 0x198   :  { %v210_v30 = vmul.f32 %v417_v24, %v208_v29 }
 0x19a   :  { %212 = vrot.lane.b32.xlu1 %v210_v30, %s502_s6 }
 0x19b   :  { %v203_v31 = vpop.permute.xlu0 %202 }
 0x19c   :  { %v205_v32 = vmul.f32 %v417_v24, %v203_v31 }
 0x20c   :  { %v213_v33 = vpop.permute.xlu1 %212 }
 0x20d   :  { %v215_v34 = vadd.f32 %v213_v33, %v205_v32 }
 0x20f   :  { %v335_v35 = vmul.f32 -2.0, %v215_v34 }
 0x211   :  { %v218_v36 = vmul.f32 1.442695, %v335_v35 }
 0x213   :  { %418 = vpow2.f32 %v218_v36 }
 0x21d   :  { %v419_v37 = vpop.eup %418 }
 0x21e   :  { %v220_v38 = vadd.f32 1.0, %v419_v37 }
 0x220   :  { %420 = vrcp.f32 %v220_v38 }
 0x22a   :  { %v421_v45 = vpop.eup %420 }
 0x22b   :  { %v223_v46 = vmul.f32 2.0, %v421_v45 }
 0x22d   :  { %v336_v47 = vadd.f32 -1.0, %v223_v46 }
 0x22f   :  { %226 = vrot.lane.b32.xlu1 %v336_v47, %s501_s1 }
 0x2a1   :  { %v227_v48 = vpop.permute.xlu1 %226 }
 0x2a2   :  { %v229_v49 = vmul.f32 %v417_v24, %v227_v48 }
 0x2a4   :  { %236 = vrot.lane.b32.xlu0 %v229_v49, %s502_s6 }
 0x316   :  { %v237_v50 = vpop.permute.xlu0 %236 }
 0x317   :  { %384 = vmatmul.mubr.msk.f32.vlgmr.msra.gmra.mrb[2].mxu0 %vm44_vm1, %v237_v50 }
 0x3ea   :  { %v306_v52 = vpop.f32.mrb[2].mxu0 }
 0x3eb   :  { %v307_v53 = vadd.f32 %v306_v52, %v234_v51  ;;  %v385_v54 = vpop.f32.mrb[3].mxu0 }
 0x3ed   :  { %310 = vst [vmem:[#allocation7] sm:$0xff] %v307_v53 }
 0x3ee   :  { %312 = vst.msk [vmem:[#allocation7] sm:$0xff] %vm44_vm1, %v237_v50 }
 0x3ef   :  { %314 = vst.msk [vmem:[#allocation7] sm:$0xff] %vm313_vm2, %v215_v34 }
 0x3f0   :  { %477 = shalt.err (!%p474_p6)
}
 0x3f1   :  { %s478_s12 = scalar_lea.hbm %s577_s2, 128 }
 0x3f2   :  { %p479_p7 = scmp.ne.s32.totalorder %s577_s2, %s478_s12  ;;  %p482_p8 = scmp.lt.u32.totalorder %s478_s12, %s577_s2 }
 0x3f4   :  { %p484_p9 = pnand %p482_p8, %p479_p7 }
 0x3f6   :  { %487 = shalt.err (!%p484_p9)
}
 0x3f7   :  { %324 = dma.vmem_to_hbm [thread:$0]  %s322_s8, 128, %s577_s2, [#allocation4]  }
 0x3f8   :  { %492 = dma.done.wait [#allocation4], 128  }
 0x3f9   :  { %493 = vsyncadd [#allocation4], 4294967168 }
 0x3fa   :  { %328 = vsyncpa [#allocation3], 1 }
 0x3fb   :  { %329 = vsyncpa [#allocation6], 1 }
 0x3fc   :  { %330 = vsyncpa [#allocation4], 1 }

</bundles_post_ra>
